<compile_context>
chip_gen: v7x
topology: tpu7x:2x2x1
jax: 0.10.0
libtpu: 0.0.40
codegen_flags: <defaults>
</compile_context>

<pallas_src>
import jax
import jax.numpy as jnp
from jax import lax
from jax.experimental import pallas as pl
from jax.experimental.pallas import tpu as pltpu


# ------------------------------------------------------------------
# Kernel: entire 4-layer MLP fused in one Pallas body, batch on lanes.
# ------------------------------------------------------------------
def critic_kernel(x_ref,
                  w1_ref, b1_ref,
                  w2_ref, b2_ref,
                  w3_ref, b3_ref,
                  w4_ref, b4_ref,
                  o_ref):
    cdt = w1_ref.dtype                       # matmul/activation dtype (f32 or bf16)

    # Natural-layout tile (tile_b, S); in-VMEM cast is a no-op when dtypes match.
    x = x_ref[...].astype(cdt)

    # Layer 1: contract on x's LAST axis -> (64, tile_b); batch ends up on lanes.
    y1 = lax.dot_general(w1_ref[...], x, (((1,), (1,)), ((), ())),
                         preferred_element_type=jnp.float32)
    h1 = jnp.tanh(y1.astype(cdt) + b1_ref[...])               # (64, tb)

    y2 = jnp.dot(w2_ref[...], h1, preferred_element_type=jnp.float32)
    h2 = jnp.tanh(y2.astype(cdt) + b2_ref[...])                # (32, tb)

    y3 = jnp.dot(w3_ref[...], h2, preferred_element_type=jnp.float32)
    h3 = jnp.tanh(y3.astype(cdt) + b3_ref[...])                # (8, tb)

    out = jnp.dot(w4_ref[...], h3, preferred_element_type=jnp.float32) \
          + b4_ref[...]                                        # (1, tb)  f32, lane-dense
    o_ref[...] = out.astype(o_ref.dtype)


def _round_up(v, m):
    return ((v + m - 1) // m) * m


def critic_forward(x, params, *, tile_b=None, compute_dtype=jnp.float32):
    """x: (B, state_dim).  params: PyTorch-layout weights (out,in), biases (out,1).

    Returns (B, 1) float32, identical semantics to Critic.forward.
    """
    B, S = x.shape

    # ---- batch tile selection (lane dimension of the activations) ----------
    if tile_b is None:
        desired = 2048                       # amortizes ~0.35us/step grid overhead
        if B <= 128:
            tile_b = 128
        elif B <= 2 * desired:
            # >=2 roughly equal lane-aligned tiles: both v7x TCs get work via
            # the 'parallel' axis, and tile i+1's x DMA overlaps tile i compute.
            tile_b = max(128, _round_up(-(-B // 2), 128))
        else:
            tile_b = desired
    n_tiles = pl.cdiv(B, tile_b)
    Bp = n_tiles * tile_b

    # x stays in natural (B, S) layout: one contiguous DMA burst per tile.
    # Only ragged batches get zero row-padding (deterministic padded columns,
    # sliced off below; padded rows never mix with real ones — no reductions
    # over batch).
    if Bp != B:
        x = jnp.pad(x, ((0, Bp - B), (0, 0)))

    # Tiny params: cast in the wrapper (negligible), biases b1..b3 live in the
    # compute dtype so the bias-add + tanh runs bf16 on v6e/v7x when requested.
    w1 = params["w1"].astype(compute_dtype); b1 = params["b1"].astype(compute_dtype)
    w2 = params["w2"].astype(compute_dtype); b2 = params["b2"].astype(compute_dtype)
    w3 = params["w3"].astype(compute_dtype); b3 = params["b3"].astype(compute_dtype)
    w4 = params["w4"].astype(compute_dtype); b4 = params["b4"]   # final bias-add in f32

    def full_spec(a):
        return pl.BlockSpec(a.shape, lambda i: (0,) * a.ndim)

    out_t = pl.pallas_call(
        critic_kernel,
        out_shape=jax.ShapeDtypeStruct((1, Bp), jnp.float32),
        grid_spec=pltpu.PrefetchScalarGridSpec(
            num_scalar_prefetch=0,
            grid=(n_tiles,),
            in_specs=[
                pl.BlockSpec((tile_b, S), lambda i: (i, 0)),   # x, natural layout
                full_spec(w1), full_spec(b1),
                full_spec(w2), full_spec(b2),
                full_spec(w3), full_spec(b3),
                full_spec(w4), full_spec(b4),
            ],
            out_specs=pl.BlockSpec((1, tile_b), lambda i: (0, i)),  # lane-dense
        ),
        compiler_params=pltpu.CompilerParams(
            dimension_semantics=("parallel",)),
    )(x, w1, b1, w2, b2, w3, b3, w4, b4)

    return out_t[:, :B].T                                       # (B, 1)


# ------------------------------------------------------------------
# Deterministic parameter init mirroring init_():
#   orthogonal weights with tanh gain (5/3), zero biases.
# ------------------------------------------------------------------
def make_params(key, state_dim):
    gain = 5.0 / 3.0  # torch.nn.init.calculate_gain('tanh')
    dims = [state_dim, 64, 32, 8, 1]
    ortho = jax.nn.initializers.orthogonal(scale=gain)
    params = {}
    keys = jax.random.split(key, 4)
    for li, (din, dout) in enumerate(zip(dims[:-1], dims[1:]), start=1):
        params[f"w{li}"] = ortho(keys[li - 1], (dout, din), jnp.float32)
        params[f"b{li}"] = jnp.zeros((dout, 1), jnp.float32)
    return params


def critic_ref(x, p):
    h = jnp.tanh(x @ p["w1"].T + p["b1"].T)
    h = jnp.tanh(h @ p["w2"].T + p["b2"].T)
    h = jnp.tanh(h @ p["w3"].T + p["b3"].T)
    return h @ p["w4"].T + p["b4"].T


if __name__ == "__main__":
    key = jax.random.PRNGKey(0)
    kx, kp = jax.random.split(key)

    batch, state_dim = 256, 16
    x = jax.random.normal(kx, (batch, state_dim), dtype=jnp.float32)
    params = make_params(kp, state_dim)
    ref = critic_ref(x, params)

    # float32 path (default): tight tolerance, works on v5e/v6e/v7x.
    out = jax.block_until_ready(critic_forward(x, params))
    assert out.shape == (batch, 1)
    assert jnp.allclose(out, ref, atol=1e-5, rtol=1e-5)

    # bf16 compute path (f32 MXU accumulation, bf16 bias+tanh): for v6e/v7x.
    out_bf16 = jax.block_until_ready(
        critic_forward(x, params, compute_dtype=jnp.bfloat16))
    assert jnp.allclose(out_bf16, ref, atol=5e-2, rtol=5e-2)

    # Ragged batch (not a tile multiple): wrapper row-pads and slices.
    x_small = x[:96]
    out_small = jax.block_until_ready(critic_forward(x_small, params))
    assert out_small.shape == (96, 1)
    assert jnp.allclose(out_small, ref[:96], atol=1e-5, rtol=1e-5)

    # Larger ragged batch exercising the big-tile heuristic (tile_b=2048).
    x_big = jax.random.normal(kx, (5000, state_dim), dtype=jnp.float32)
    ref_big = critic_ref(x_big, params)
    out_big = jax.block_until_ready(critic_forward(x_big, params))
    assert out_big.shape == (5000, 1)
    assert jnp.allclose(out_big, ref_big, atol=1e-5, rtol=1e-5)

    print("KERNEL_OK")
</pallas_src>

<mosaic_0001>
module attributes {stable_mosaic.version = 11 : i64} {
  func.func @critic_kernel(%arg0: i32, %arg1: memref<128x16xf32, #tpu.memory_space<vmem>>, %arg2: memref<64x16xf32, #tpu.memory_space<vmem>>, %arg3: memref<64x1xf32, #tpu.memory_space<vmem>>, %arg4: memref<32x64xf32, #tpu.memory_space<vmem>>, %arg5: memref<32x1xf32, #tpu.memory_space<vmem>>, %arg6: memref<8x32xf32, #tpu.memory_space<vmem>>, %arg7: memref<8x1xf32, #tpu.memory_space<vmem>>, %arg8: memref<1x8xf32, #tpu.memory_space<vmem>>, %arg9: memref<1x1xf32, #tpu.memory_space<vmem>>, %arg10: memref<1x128xf32, #tpu.memory_space<vmem>>) attributes {dimension_semantics = [#tpu.dimension_semantics<parallel>], iteration_bounds = array<i64: 2>, scalar_prefetch = 0 : i64, scratch_operands = 0 : i64, tpu.core_type = #tpu.core_type<tc>, window_params = [{transform_indices = @transform_0, window_bounds = array<i64: 128, 16>}, {pipeline_mode = #tpu.pipeline_mode<synchronous>, transform_indices = @transform_1, window_bounds = array<i64: 64, 16>}, {pipeline_mode = #tpu.pipeline_mode<synchronous>, transform_indices = @transform_2, window_bounds = array<i64: 64, 1>}, {pipeline_mode = #tpu.pipeline_mode<synchronous>, transform_indices = @transform_3, window_bounds = array<i64: 32, 64>}, {pipeline_mode = #tpu.pipeline_mode<synchronous>, transform_indices = @transform_4, window_bounds = array<i64: 32, 1>}, {pipeline_mode = #tpu.pipeline_mode<synchronous>, transform_indices = @transform_5, window_bounds = array<i64: 8, 32>}, {pipeline_mode = #tpu.pipeline_mode<synchronous>, transform_indices = @transform_6, window_bounds = array<i64: 8, 1>}, {pipeline_mode = #tpu.pipeline_mode<synchronous>, transform_indices = @transform_7, window_bounds = array<i64: 1, 8>}, {pipeline_mode = #tpu.pipeline_mode<synchronous>, transform_indices = @transform_8, window_bounds = array<i64: 1, 1>}, {transform_indices = @transform_9, window_bounds = array<i64: 1, 128>}]} {
    %c0 = arith.constant 0 : index
    %c0_0 = arith.constant 0 : index
    %0 = vector.load %arg1[%c0, %c0_0] : memref<128x16xf32, #tpu.memory_space<vmem>>, vector<128x16xf32>
    %c0_1 = arith.constant 0 : index
    %c0_2 = arith.constant 0 : index
    %1 = vector.load %arg2[%c0_1, %c0_2] : memref<64x16xf32, #tpu.memory_space<vmem>>, vector<64x16xf32>
    %cst = arith.constant dense<0.000000e+00> : vector<64x128xf32>
    %2 = tpu.matmul %1, %0, %cst {dimension_numbers = #tpu.dot_dimension_numbers<[1], [1], [0], [0], [0, 0, 1, 0], [], []>} : vector<64x16xf32>, vector<128x16xf32>, vector<64x128xf32> -> vector<64x128xf32>
    %c0_3 = arith.constant 0 : index
    %c0_4 = arith.constant 0 : index
    %3 = vector.load %arg3[%c0_3, %c0_4] : memref<64x1xf32, #tpu.memory_space<vmem>>, vector<64x1xf32>
    %4 = vector.broadcast %3 : vector<64x1xf32> to vector<64x128xf32>
    %5 = arith.addf %2, %4 : vector<64x128xf32>
    %6 = math.tanh %5 : vector<64x128xf32>
    %c0_5 = arith.constant 0 : index
    %c0_6 = arith.constant 0 : index
    %7 = vector.load %arg4[%c0_5, %c0_6] : memref<32x64xf32, #tpu.memory_space<vmem>>, vector<32x64xf32>
    %cst_7 = arith.constant dense<0.000000e+00> : vector<32x128xf32>
    %8 = tpu.matmul %7, %6, %cst_7 {dimension_numbers = #tpu.dot_dimension_numbers<[1], [0], [0], [1], [0, 0, 1, 1], [], []>} : vector<32x64xf32>, vector<64x128xf32>, vector<32x128xf32> -> vector<32x128xf32>
    %c0_8 = arith.constant 0 : index
    %c0_9 = arith.constant 0 : index
    %9 = vector.load %arg5[%c0_8, %c0_9] : memref<32x1xf32, #tpu.memory_space<vmem>>, vector<32x1xf32>
    %10 = vector.broadcast %9 : vector<32x1xf32> to vector<32x128xf32>
    %11 = arith.addf %8, %10 : vector<32x128xf32>
    %12 = math.tanh %11 : vector<32x128xf32>
    %c0_10 = arith.constant 0 : index
    %c0_11 = arith.constant 0 : index
    %13 = vector.load %arg6[%c0_10, %c0_11] : memref<8x32xf32, #tpu.memory_space<vmem>>, vector<8x32xf32>
    %cst_12 = arith.constant dense<0.000000e+00> : vector<8x128xf32>
    %14 = tpu.matmul %13, %12, %cst_12 {dimension_numbers = #tpu.dot_dimension_numbers<[1], [0], [0], [1], [0, 0, 1, 1], [], []>} : vector<8x32xf32>, vector<32x128xf32>, vector<8x128xf32> -> vector<8x128xf32>
    %c0_13 = arith.constant 0 : index
    %c0_14 = arith.constant 0 : index
    %15 = vector.load %arg7[%c0_13, %c0_14] : memref<8x1xf32, #tpu.memory_space<vmem>>, vector<8x1xf32>
    %16 = vector.broadcast %15 : vector<8x1xf32> to vector<8x128xf32>
    %17 = arith.addf %14, %16 : vector<8x128xf32>
    %18 = math.tanh %17 : vector<8x128xf32>
    %c0_15 = arith.constant 0 : index
    %c0_16 = arith.constant 0 : index
    %19 = vector.load %arg8[%c0_15, %c0_16] : memref<1x8xf32, #tpu.memory_space<vmem>>, vector<1x8xf32>
    %cst_17 = arith.constant dense<0.000000e+00> : vector<1x128xf32>
    %20 = tpu.matmul %19, %18, %cst_17 {dimension_numbers = #tpu.dot_dimension_numbers<[1], [0], [0], [1], [0, 0, 1, 1], [], []>} : vector<1x8xf32>, vector<8x128xf32>, vector<1x128xf32> -> vector<1x128xf32>
    %c0_18 = arith.constant 0 : index
    %c0_19 = arith.constant 0 : index
    %21 = vector.load %arg9[%c0_18, %c0_19] : memref<1x1xf32, #tpu.memory_space<vmem>>, vector<1x1xf32>
    %22 = vector.broadcast %21 : vector<1x1xf32> to vector<1x128xf32>
    %23 = arith.addf %20, %22 : vector<1x128xf32>
    %c0_20 = arith.constant 0 : index
    %c0_21 = arith.constant 0 : index
    %24 = vector.load %arg10[%c0_20, %c0_21] : memref<1x128xf32, #tpu.memory_space<vmem>>, vector<1x128xf32>
    tpu.vector_store %arg10[%c0_20, %c0_21], %23 {strides = array<i32>} : memref<1x128xf32, #tpu.memory_space<vmem>>, vector<1x128xf32>,
    return
  }
  func.func @transform_0(%arg0: i32) -> (i32, i32) {
    %c0_i32 = arith.constant 0 : i32
    %c0_i32_0 = arith.constant 0 : i32
    return %arg0, %c0_i32 : i32, i32
  }
  func.func @transform_1(%arg0: i32) -> (i32, i32) {
    %c0_i32 = arith.constant 0 : i32
    %c0_i32_0 = arith.constant 0 : i32
    %c0_i32_1 = arith.constant 0 : i32
    return %c0_i32, %c0_i32_0 : i32, i32
  }
  func.func @transform_2(%arg0: i32) -> (i32, i32) {
    %c0_i32 = arith.constant 0 : i32
    %c0_i32_0 = arith.constant 0 : i32
    %c0_i32_1 = arith.constant 0 : i32
    return %c0_i32, %c0_i32_0 : i32, i32
  }
  func.func @transform_3(%arg0: i32) -> (i32, i32) {
    %c0_i32 = arith.constant 0 : i32
    %c0_i32_0 = arith.constant 0 : i32
    %c0_i32_1 = arith.constant 0 : i32
    return %c0_i32, %c0_i32_0 : i32, i32
  }
  func.func @transform_4(%arg0: i32) -> (i32, i32) {
    %c0_i32 = arith.constant 0 : i32
    %c0_i32_0 = arith.constant 0 : i32
    %c0_i32_1 = arith.constant 0 : i32
    return %c0_i32, %c0_i32_0 : i32, i32
  }
  func.func @transform_5(%arg0: i32) -> (i32, i32) {
    %c0_i32 = arith.constant 0 : i32
    %c0_i32_0 = arith.constant 0 : i32
    %c0_i32_1 = arith.constant 0 : i32
    return %c0_i32, %c0_i32_0 : i32, i32
  }
  func.func @transform_6(%arg0: i32) -> (i32, i32) {
    %c0_i32 = arith.constant 0 : i32
    %c0_i32_0 = arith.constant 0 : i32
    %c0_i32_1 = arith.constant 0 : i32
    return %c0_i32, %c0_i32_0 : i32, i32
  }
  func.func @transform_7(%arg0: i32) -> (i32, i32) {
    %c0_i32 = arith.constant 0 : i32
    %c0_i32_0 = arith.constant 0 : i32
    %c0_i32_1 = arith.constant 0 : i32
    return %c0_i32, %c0_i32_0 : i32, i32
  }
  func.func @transform_8(%arg0: i32) -> (i32, i32) {
    %c0_i32 = arith.constant 0 : i32
    %c0_i32_0 = arith.constant 0 : i32
    %c0_i32_1 = arith.constant 0 : i32
    return %c0_i32, %c0_i32_0 : i32, i32
  }
  func.func @transform_9(%arg0: i32) -> (i32, i32) {
    %c0_i32 = arith.constant 0 : i32
    %c0_i32_0 = arith.constant 0 : i32
    return %c0_i32, %arg0 : i32, i32
  }
}

</mosaic_0001>

<bundles_post_ra>
// kernel: tpu_custom_call.1
= control target key start
LH: loop header
LB: loop body
LE: loop exit
PB: predicated region body
PF: predicated region fallthrough
CT: control target
= control target key end

     0   :  { %s1635_s0 = inlined_call_operand.vmem [shape: f32[256,16], index: 0, kind: input, shape index: {}]   ;;  %s1636_s1 = inlined_call_operand.vmem [shape: f32[64,16], index: 1, kind: input, shape index: {}]   ;;  %s1637_s2 = inlined_call_operand.vmem [shape: f32[64,1], index: 2, kind: input, shape index: {}]   ;;  %s1638_s3 = inlined_call_operand.vmem [shape: f32[32,64], index: 3, kind: input, shape index: {}]   ;;  %s1639_s4 = inlined_call_operand.vmem [shape: f32[32,1], index: 4, kind: input, shape index: {}]   ;;  %s1640_s5 = inlined_call_operand.vmem [shape: f32[8,32], index: 5, kind: input, shape index: {}]   ;;  %s1641_s6 = inlined_call_operand.vmem [shape: f32[8,1], index: 6, kind: input, shape index: {}]   ;;  %s1642_s7 = inlined_call_operand.vmem [shape: f32[1,8], index: 7, kind: input, shape index: {}]   ;;  %s1643_s8 = inlined_call_operand.<no memory space> [shape: f32[1,1], index: 8, kind: input, shape index: {}]   ;;  %s1644_s9 = inlined_call_operand.hbm [shape: f32[1,256], index: 9, kind: output, shape index: {}]  }
   0x1   :  { %v14_v0 = vstv %s1643_s8 }
   0x2   :  { %15 = vst [vmem:[#allocation2] sm:$0x1] %v14_v0 }
   0x3   :  { %16 = vsyncpa [#allocation4], 0 }
   0x4   :  { %18 = vsyncpa [#allocation4 + $0x1], 0  ;;  %s1385_s11 = smov 0   ;;  %s1387_s12 = smov 0  }
   0x5   :  { %s1389_s13 = smov 0   ;;  %s1391_s14 = smov 0  }
   0x6 LB: > { %s957_s8 = sadd.s32 4294967295, %s1325_s14   ;;  %s958_s15 = sadd.s32 4294967294, %s1325_s14   ;;  %s1325_s14 = sphi %s1391_s14, %s1652_s14   ;;  %s1321_s13 = sphi %s1389_s13, %s1651_s13   ;;  %s1317_s12 = sphi %s1387_s12, %s1650_s12   ;;  %s1313_s11 = sphi %s1385_s11, %s1649_s11  }
   0x7   : > { %s1408_s16 = sadd.s32 1, %s1325_s14   ;;  %s225_s17 = sadd.s32 1, %s1321_s13 }
   0x8   : > { %s222_s18 = ssub.s32 %s1325_s14, %s1408_s16  ;;  %p235_p0 = scmp.ne.s32.totalorder %s1321_s13, %s1317_s12 }
   0x9   : > { %p223_p1 = scmp.eq.s32.totalorder %s222_s18, 0  ;;  %p236_p2 = scmp.eq.s32.totalorder %s957_s8, 1 }
   0xa   : > { %p241_p3 = scmp.ne.s32.totalorder %s1317_s12, %s1313_s11  ;;  %p242_p4 = scmp.eq.s32.totalorder %s958_s15, 1 }
   0xb   : > { %s1418_s19 = scalar_select %p223_p1, %s1321_s13, %s225_s17  }
   0xc   : > { %p1420_p5 = por %p236_p2, %p235_p0  ;;  %p1424_p6 = por %p242_p4, %p241_p3 }
   0xd   : > { %p961_p7 = scmp.ge.s32.totalorder %s1325_s14, 1  ;;  %p293_p8 = scmp.lt.s32.totalorder %s1325_s14, 3 }
   0xf   : > { %p294_p9 = pnand %p961_p7, %p293_p8 }
  0x10   : > { %s1430_s22 = sshll.u32 (!%p294_p9), %s957_s8, 4  ;;  %vm406_vm0 = vcmask (!%p294_p9), 130048   ;;  %v350_v1 = vld [vmem:[%s1636_s1] sm:$0xff] (!%p294_p9)  ;;  %v1327_v2 = vmov (!%p294_p9), 0   ;;  %v360_v4 = vld [vmem:[%s1637_s2 + $0x10] sm:$0xff] (!%p294_p9)  ;;  %v359_v5 = vld [vmem:[%s1637_s2 + $0x8] sm:$0xff] (!%p294_p9) }
  0x11   : > { %297 = sbr.rel (%p294_p9) target bundleno = 1028 (0x404), region = 56  ;;  %p329_p10 = scmp.lt.s32.totalorder (!%p294_p9), %s1430_s22, 31  ;;  %1072 = vmatprep.mubr.msk.f32.mxu0 (!%p294_p9), %vm406_vm0, %v350_v1  ;;  %1235 = vset.pattern.permute.xlu0 (!%p294_p9), %v1327_v2  ;;  %v358_v3 = vld [vmem:[%s1637_s2] sm:$0xff] (!%p294_p9)  ;;  %v361_v6 = vld [vmem:[%s1637_s2 + $0x18] sm:$0xff] (!%p294_p9)  ;;  %vm1457_vm1 = vmpackc.low (!%p294_p9), %vm406_vm0, %vm406_vm0  ;;  %vm620_vm2 = vcmask (!%p294_p9), 523264   ;;  %vm1329_vm3 = vmmov (!%p294_p9), 0  }
  0x12   : > { %1236 = vset.pattern.permute.xlu1 (!%p294_p9), %v1327_v2  ;;  %368 = vperm.xlu0 (!%p294_p9), %1235, %v358_v3   ;;  %v362_v14 = vld [vmem:[%s1637_s2 + $0x20] sm:$0xff] (!%p294_p9)  ;;  %v363_v15 = vld [vmem:[%s1637_s2 + $0x28] sm:$0xff] (!%p294_p9)  ;;  %v364_v18 = vld [vmem:[%s1637_s2 + $0x30] sm:$0xff] (!%p294_p9)  ;;  %vm729_vm4 = vcmask (!%p294_p9), 261120   ;;  %vm815_vm5 = vcmask (!%p294_p9), 64512   ;;  %s326_s10 = sand.u32 (!%p294_p9), 1, %s1317_s12   ;;  %s1593_s18 = scalar_lea.hbm (!%p294_p9), %s1644_s9, %s1430_s22 }
  0x13   : > { %378 = vperm.xlu1 (!%p294_p9), %1236, %v360_v4   ;;  %v365_v19 = vld [vmem:[%s1637_s2 + $0x38] sm:$0xff] (!%p294_p9)  ;;  %v596_v21 = vld [vmem:[%s1639_s4] sm:$0xff] (!%p294_p9)  ;;  %v597_v22 = vld [vmem:[%s1639_s4 + $0x8] sm:$0xff] (!%p294_p9)  ;;  %s327_s8 = scalar_lea.vmem (!%p294_p9), [#allocation3], %s326_s10  ;;  %s891_s23 = scalar_lea.sflag (!%p294_p9), [#allocation4], %s326_s10 }
  0x14   : > { %v598_v25 = vld [vmem:[%s1639_s4 + $0x10] sm:$0xff] (!%p294_p9)  ;;  %v599_v26 = vld [vmem:[%s1639_s4 + $0x18] sm:$0xff] (!%p294_p9)  ;;  %v723_v28 = vld [vmem:[%s1641_s6] sm:$0xff] (!%p294_p9)  ;;  %s903_s15 = sshll.u32 (!%p294_p9), %s327_s8, 4  ;;  %s1331_s26 = smov (!%p294_p9), [#allocation3]   ;;  %s1595_s15 = int_to_ptr.vmem [resolvable:$true] %s903_s15 }
  0x15   : > { %v805_v29 = vld [vmem:[#allocation2] sm:$0x1] (!%p294_p9)  ;;  %v351_v42 = vld [vmem:[%s1636_s1 + $0x8] sm:$0xff] (!%p294_p9)  ;;  %v352_v43 = vld [vmem:[%s1636_s1 + $0x10] sm:$0xff] (!%p294_p9)  ;;  %s1267_s27 = sshll.u32 (!%p294_p9), %s1331_s26, 4  ;;  %s1268_s27 = int_to_ptr.vmem [resolvable:$false] %s1267_s27 }
  0x16   : > { %373 = vperm.xlu0 (!%p294_p9), %1235, %v359_v5   ;;  %v353_v44 = vld [vmem:[%s1636_s1 + $0x18] sm:$0xff] (!%p294_p9)  ;;  %v354_v45 = vld [vmem:[%s1636_s1 + $0x20] sm:$0xff] (!%p294_p9)  ;;  %v355_v46 = vld [vmem:[%s1636_s1 + $0x28] sm:$0xff] (!%p294_p9)  ;;  %s1269_s28 = scalar_lea.vmem (!%p294_p9), %s1268_s27, 32  ;;  %p1270_p0 = scmp.lt.s32.totalorder (!%p294_p9), %s1595_s15, %s1268_s27 }
  0x17   : > { %383 = vperm.xlu1 (!%p294_p9), %1236, %v361_v6   ;;  %v356_v47 = vld [vmem:[%s1636_s1 + $0x30] sm:$0xff] (!%p294_p9)  ;;  %v357_v48 = vld [vmem:[%s1636_s1 + $0x38] sm:$0xff] (!%p294_p9)  ;;  %v592_v49 = vld [vmem:[%s1638_s3] sm:$0xff] (!%p294_p9) }
  0x18   : > { %s330_s25 = scalar_select %p329_p10, %s1430_s22, 31  ;;  %1100 = vmatprep.mubr.msk.f32.mxu1 %vm620_vm2, %v592_v49 }
  0x1a   : > { %s963_s30 = sshll.u32 %s330_s25, 3  ;;  %388 = vperm.xlu0 %1235, %v362_v14   ;;  %s1263_s25 = scalar_lea.vmem %s1595_s15, 16 }
  0x1b   : > { %s1453_s24 = scalar_lea.vmem %s1635_s0, %s963_s30  ;;  %393 = vperm.xlu1 %1236, %v363_v15   ;;  %p1264_p11 = scmp.ne.s32.totalorder %s1595_s15, %s1263_s25 }
  0x1c   : > { %v334_v8 = vld [vmem:[%s1453_s24] sm:$0xff]  ;;  %v335_v9 = vld [vmem:[%s1453_s24 + $0x8] sm:$0xff]  ;;  %v336_v10 = vld [vmem:[%s1453_s24 + $0x10] sm:$0xff]  ;;  %p1271_p1 = scmp.lt.s32.totalorder %s1269_s28, %s1263_s25 }
  0x1d   : > { %v1122_v11 = vpack.c.bf16 %v335_v9, %v334_v8  ;;  %v337_v12 = vld [vmem:[%s1453_s24 + $0x18] sm:$0xff]  ;;  %v338_v16 = vld [vmem:[%s1453_s24 + $0x20] sm:$0xff]  ;;  %v339_v17 = vld [vmem:[%s1453_s24 + $0x28] sm:$0xff]  ;;  %p1265_p12 = pnand %p1264_p11, %p1420_p5 }
  0x1e   : > { %v1128_v13 = vpack.c.bf16 %v337_v12, %v336_v10  ;;  %v1134_v20 = vpack.c.bf16 %v339_v17, %v338_v16  ;;  %398 = vperm.xlu0 %1235, %v364_v18   ;;  %v340_v23 = vld [vmem:[%s1453_s24 + $0x30] sm:$0xff]  ;;  %v341_v24 = vld [vmem:[%s1453_s24 + $0x38] sm:$0xff]  ;;  %v342_v30 = vld [vmem:[%s1453_s24 + $0x40] sm:$0xff]  ;;  %p1272_p2 = por %p1271_p1, %p1270_p0 }
  0x1f   : > { %1124 = vmatprep.subr.msk.bf16.mxu0 %vm1457_vm1, %v1122_v11  ;;  %403 = vperm.xlu1 %1236, %v365_v19   ;;  %v1140_v27 = vpack.c.bf16 %v341_v24, %v340_v23  ;;  %v343_v31 = vld [vmem:[%s1453_s24 + $0x48] sm:$0xff]  ;;  %v344_v33 = vld [vmem:[%s1453_s24 + $0x50] sm:$0xff]  ;;  %v345_v34 = vld [vmem:[%s1453_s24 + $0x58] sm:$0xff]  ;;  %p1266_p13 = pneg %p1265_p12 }
  0x20   : > { %1127 = vmatpush3.bf16.xpose.msk.msra.mxu0 %vm1457_vm1, %v1122_v11  ;;  %v1146_v32 = vpack.c.bf16 %v343_v31, %v342_v30  ;;  %v1152_v35 = vpack.c.bf16 %v345_v34, %v344_v33  ;;  %v346_v36 = vld [vmem:[%s1453_s24 + $0x60] sm:$0xff]  ;;  %v347_v37 = vld [vmem:[%s1453_s24 + $0x68] sm:$0xff]  ;;  %v348_v39 = vld [vmem:[%s1453_s24 + $0x70] sm:$0xff] }
  0x21   : > { %1130 = vmatprep.subr.msk.bf16.mxu0 %vm1457_vm1, %v1128_v13  ;;  %v1158_v38 = vpack.c.bf16 %v347_v37, %v346_v36  ;;  %v349_v40 = vld [vmem:[%s1453_s24 + $0x78] sm:$0xff]  ;;  %v594_v23 = vld [vmem:[%s1638_s3 + $0x10] sm:$0xff]  ;;  %p1273_p3 = pnand %p1272_p2, %p1266_p13 }
  0x22   : > { %602 = vperm.xlu0 %1235, %v596_v21   ;;  %v1164_v41 = vpack.c.bf16 %v349_v40, %v348_v39  ;;  %v595_v24 = vld [vmem:[%s1638_s3 + $0x18] sm:$0xff] }
  0x23   : > { %607 = vperm.xlu1 %1236, %v597_v22   ;;  %v593_v22 = vld [vmem:[%s1638_s3 + $0x8] sm:$0xff] }
  0x26   : > { %612 = vperm.xlu0 %1235, %v598_v25   ;;  %v1328_v25 = vmov 0.0|0.0  }
  0x27   : > { %617 = vperm.xlu1 %1236, %v599_v26   ;;  %v1330_v26 = vmov 0.0  }
  0x28   : > { %1133 = vmatpush3.bf16.xpose.msk.msra.mxu0 %vm1457_vm1, %v1128_v13 }
  0x29   : > { %1136 = vmatprep.subr.msk.bf16.mxu0 %vm1457_vm1, %v1134_v20 }
  0x2a   : > { %726 = vperm.xlu0 %1235, %v723_v28  }
  0x2b   : > { %808 = vperm.xlu1 %1236, %v805_v29  }
  0x30   : > { %1139 = vmatpush3.bf16.xpose.msk.msra.mxu0 %vm1457_vm1, %v1134_v20 }
  0x31   : > { %1142 = vmatprep.subr.msk.bf16.mxu0 %vm1457_vm1, %v1140_v27 }
  0x38   : > { %1145 = vmatpush3.bf16.xpose.msk.msra.mxu0 %vm1457_vm1, %v1140_v27 }
  0x39   : > { %1148 = vmatprep.subr.msk.bf16.mxu0 %vm1457_vm1, %v1146_v32 }
  0x40   : > { %1151 = vmatpush3.bf16.xpose.msk.msra.mxu0 %vm1457_vm1, %v1146_v32 }
  0x41   : > { %1154 = vmatprep.subr.msk.bf16.mxu0 %vm1457_vm1, %v1152_v35 }
  0x48   : > { %1157 = vmatpush3.bf16.xpose.msk.msra.mxu0 %vm1457_vm1, %v1152_v35 }
  0x49   : > { %1160 = vmatprep.subr.msk.bf16.mxu0 %vm1457_vm1, %v1158_v38 }
  0x50   : > { %1163 = vmatpush3.bf16.xpose.msk.msra.mxu0 %vm1457_vm1, %v1158_v38 }
  0x51   : > { %1166 = vmatprep.subr.msk.bf16.mxu0 %vm1457_vm1, %v1164_v41 }
  0x58   : > { %1169 = vmatpush3.bf16.xpose.msk.msra.mxu0 %vm1457_vm1, %v1164_v41 }
  0x5f   : > { %1073 = vmatmul.mubr.msk.f32.vlgmr.msra.gmra.mrb[0].mxu0 %vm406_vm0, %v351_v42 }
  0x60   : > { %1075 = vmatprep.mubr.msk.f32.mxu0 %vm406_vm0, %v352_v43 }
  0x63   : > { %1076 = vmatmul.mubr.msk.f32.gmra.mrb[2].mxu0 %vm406_vm0, %v353_v44 }
  0x64   : > { %1078 = vmatprep.mubr.msk.f32.mxu0 %vm406_vm0, %v354_v45  ;;  %v722_v45 = vld [vmem:[%s1640_s5] sm:$0xff] }
  0x67   : > { %1079 = vmatmul.mubr.msk.f32.gmra.mrb[4].mxu0 %vm406_vm0, %v355_v46 }
  0x68   : > { %1081 = vmatprep.mubr.msk.f32.mxu0 %vm406_vm0, %v356_v47 }
  0x6b   : > { %1082 = vmatmul.mubr.msk.f32.gmra.mrb[6].mxu0 %vm406_vm0, %v357_v48 }
  0x91   : > { %v369_v50 = vpop.permute.xlu0 %368 }
  0x92   : > { %v379_v51 = vpop.permute.xlu1 %378 }
  0x95   : > { %v374_v52 = vpop.permute.xlu0 %373 }
  0x96   : > { %v384_v53 = vpop.permute.xlu1 %383 }
  0x99   : > { %v389_v63 = vpop.permute.xlu0 %388 }
  0x9a   : > { %v394_v61 = vpop.permute.xlu1 %393 }
  0x9d   : > { %v399_v7 = vpop.permute.xlu0 %398 }
  0x9e   : > { %v404_v4 = vpop.permute.xlu1 %403 }
  0xa1   : > { %v603_v28 = vpop.permute.xlu0 %602 }
  0xa2   : > { %v608_v27 = vpop.permute.xlu1 %607 }
  0xa5   : > { %v613_v35 = vpop.permute.xlu0 %612 }
  0xa6   : > { %v618_v33 = vpop.permute.xlu1 %617 }
  0xa9   : > { %v727_v46 = vpop.permute.xlu0 %726 }
 0x132   : > { %v1074_v54 = vpop.f32.mrb[0].mxu0 }
 0x133   : > { %v551_v55 = vadd.f32 %v1074_v54, %v374_v52  ;;  %v545_v56 = vpop.f32.mrb[1].mxu0  ;;  %v811_v52 = vlaneseq }
 0x134   : > { %v546_v57 = vadd.f32 %v545_v56, %v369_v50  ;;  %v804_v50 = vld [vmem:[%s1642_s7] sm:$0x1] }
 0x135   : > { %1237 = vtanh.f32 %v551_v55  ;;  %v809_v55 = vpop.permute.xlu1 %808 }
 0x136   : > { %1239 = vtanh.f32 %v546_v57  ;;  %v1077_v58 = vpop.f32.mrb[2].mxu0 }
 0x137   : > { %v561_v59 = vadd.f32 %v1077_v58, %v384_v53  ;;  %v555_v60 = vpop.f32.mrb[3].mxu0  ;;  %v812_v53 = vshrl.u32 %v811_v52, 7 }
 0x138   : > { %v556_v62 = vadd.f32 %v555_v60, %v379_v51 }
 0x139   : > { %1241 = vtanh.f32 %v561_v59  ;;  %v813_v54 = vsub.s32 0, %v812_v53 }
 0x13a   : > { %1243 = vtanh.f32 %v556_v62  ;;  %v1080_v0 = vpop.f32.mrb[4].mxu0 }
 0x13b   : > { %v571_v1 = vadd.f32 %v1080_v0, %v394_v61  ;;  %v565_v2 = vpop.f32.mrb[5].mxu0  ;;  %v814_v56 = vrot.slane %v809_v55, %v813_v54 }
 0x13c   : > { %v566_v3 = vadd.f32 %v565_v2, %v389_v63 }
 0x13d   : > { %1245 = vtanh.f32 %v571_v1 }
 0x13e   : > { %1247 = vtanh.f32 %v566_v3  ;;  %v1083_v5 = vpop.f32.mrb[6].mxu0 }
 0x13f   : > { %v1238_v6 = vpop.eup %1237  ;;  %v581_v8 = vadd.f32 %v1083_v5, %v404_v4  ;;  %v575_v9 = vpop.f32.mrb[7].mxu0 }
 0x140   : > { %v1240_v10 = vpop.eup %1239  ;;  %v576_v11 = vadd.f32 %v575_v9, %v399_v7 }
 0x141   : > { %1249 = vtanh.f32 %v581_v8  ;;  %v1170_v12 = vpack.c.bf16 %v1238_v6, %v1240_v10 }
 0x142   : > { %1251 = vtanh.f32 %v576_v11 }
 0x143   : > { %v1242_v13 = vpop.eup %1241  ;;  %1171 = vmatprep.subr.bf16.mxu1 %v1170_v12 }
 0x144   : > { %v1244_v14 = vpop.eup %1243  ;;  %1173 = vmatpush3.bf16.msra.mxu1 %v1170_v12 }
 0x145   : > { %v1174_v15 = vpack.c.bf16 %v1242_v13, %v1244_v14 }
 0x147   : > { %v1246_v16 = vpop.eup %1245  ;;  %1175 = vmatprep.subr.bf16.mxu1 %v1174_v15 }
 0x148   : > { %v1248_v17 = vpop.eup %1247  ;;  %1177 = vmatpush3.bf16.msra.mxu1 %v1174_v15 }
 0x149   : > { %v1178_v18 = vpack.c.bf16 %v1246_v16, %v1248_v17 }
 0x14b   : > { %v1250_v19 = vpop.eup %1249  ;;  %1179 = vmatprep.subr.bf16.mxu1 %v1178_v18 }
 0x14c   : > { %v1252_v20 = vpop.eup %1251  ;;  %1181 = vmatpush3.bf16.msra.mxu1 %v1178_v18 }
 0x14d   : > { %v1182_v21 = vpack.c.bf16 %v1250_v19, %v1252_v20 }
 0x14f   : > { %1183 = vmatprep.subr.bf16.mxu1 %v1182_v21 }
 0x150   : > { %1185 = vmatpush3.bf16.msra.mxu1 %v1182_v21 }
 0x151   : > { %1186 = vmatprep.subr.bf16.mxu1 %v1328_v25 }
 0x153   : > { %1101 = vmatmul.mubr.msk.f32.vlgmr.msra.gmra.mrb[0].mxu1 %vm620_vm2, %v593_v22 }
 0x154   : > { %1103 = vmatprep.mubr.msk.f32.mxu1 %vm620_vm2, %v594_v23 }
 0x157   : > { %1104 = vmatmul.mubr.msk.f32.gmra.mrb[2].mxu1 %vm620_vm2, %v595_v24 }
 0x158   : > { %1114 = vmatprep.mubr.msk.f32.mxu1 %vm1329_vm3, %v1330_v26 }
 0x226   : > { %v1102_v29 = vpop.f32.mrb[0].mxu1 }
 0x227   : > { %v705_v30 = vadd.f32 %v1102_v29, %v608_v27  ;;  %v699_v31 = vpop.f32.mrb[1].mxu1 }
 0x228   : > { %v700_v32 = vadd.f32 %v699_v31, %v603_v28 }
 0x229   : > { %1253 = vtanh.f32 %v705_v30 }
 0x22a   : > { %1255 = vtanh.f32 %v700_v32  ;;  %v1105_v34 = vpop.f32.mrb[2].mxu1 }
 0x22b   : > { %v715_v36 = vadd.f32 %v1105_v34, %v618_v33  ;;  %v709_v37 = vpop.f32.mrb[3].mxu1 }
 0x22c   : > { %v710_v38 = vadd.f32 %v709_v37, %v613_v35 }
 0x22d   : > { %1257 = vtanh.f32 %v715_v36 }
 0x22e   : > { %1259 = vtanh.f32 %v710_v38 }
 0x233   : > { %v1254_v39 = vpop.eup %1253 }
 0x234   : > { %v1256_v40 = vpop.eup %1255 }
 0x235   : > { %v1187_v41 = vpack.c.bf16 %v1254_v39, %v1256_v40 }
 0x237   : > { %v1258_v42 = vpop.eup %1257  ;;  %1188 = vmatpush3.bf16.msra.mxu1 %v1187_v41 }
 0x238   : > { %v1260_v43 = vpop.eup %1259  ;;  %1189 = vmatprep.subr.bf16.mxu1 %v1328_v25 }
 0x239   : > { %v1190_v44 = vpack.c.bf16 %v1258_v42, %v1260_v43 }
 0x23b   : > { %1191 = vmatpush3.bf16.msra.mxu1 %v1190_v44 }
 0x23c   : > { %1117 = vmatprep.subr.mxu1 %v1330_v26 }
 0x23e   : > { %1115 = vmatmul.mubr.msk.f32.vlgmr.msra.gmra.mrb[4].mxu1 %vm729_vm4, %v722_v45 }
 0x23f   : > { %1119 = vmatprep.mubr.msk.f32.mxu1 %vm1329_vm3, %v1330_v26 }
 0x311   : > { %v799_v47 = vpop.f32.mrb[4].mxu1 }
 0x312   : > { %v800_v48 = vadd.f32 %v799_v47, %v727_v46  ;;  %v1116_v49 = vpop.f32.mrb[5].mxu1 }
 0x314   : > { %1261 = vtanh.f32 %v800_v48 }
 0x31e   : > { %v1262_v51 = vpop.eup %1261 }
 0x31f   : > { %1118 = vmatpush3.msra.mxu1 %v1262_v51 }
 0x320   : > { %1120 = vmatmul.mubr.msk.f32.vlgmr.msra.gmra.mrb[6].mxu1 %vm815_vm5, %v804_v50 }
 0x3f3   : > { %v885_v57 = vpop.f32.mrb[6].mxu1 }
 0x3f4   : > { %v886_v58 = vadd.f32 %v885_v57, %v814_v56  ;;  %v1121_v59 = vpop.f32.mrb[7].mxu1 }
 0x3f6   : > { %889 = vst [vmem:[%s327_s8] sm:$0x1] %v886_v58 }
 0x3f7   : > { %1276 = shalt.err (!%p1273_p3)
}
 0x3f8   : > { %s1277_s22 = scalar_lea.hbm %s1593_s18, 16  ;;  %s1281_s10 = scalar_lea.hbm %s1644_s9, 32 }
 0x3f9   : > { %p1278_p4 = scmp.ne.s32.totalorder %s1593_s18, %s1277_s22  ;;  %p1282_p9 = scmp.lt.u32.totalorder %s1593_s18, %s1644_s9 }
 0x3fa   : > { %p1283_p10 = scmp.lt.u32.totalorder %s1281_s10, %s1277_s22  ;;  %p1285_p12 = scmp.lt.u32.totalorder %s1277_s22, %s1593_s18 }
 0x3fb   : > { %p1279_p7 = pnand %p1278_p4, %p1420_p5 }
 0x3fc   : > { %p1284_p11 = por %p1283_p10, %p1282_p9 }
 0x3fd   : > { %p1280_p8 = pneg %p1279_p7 }
 0x3fe   : > { %p1286_p13 = por %p1285_p12, %p1284_p11 }
 0x400   : > { %p1287_p0 = pnand %p1286_p13, %p1280_p8 }
 0x402   : > { %1290 = shalt.err (!%p1287_p0)
}
 0x403   : > { %1192 = dma.vmem_to_hbm [thread:$0]  (%p1420_p5), %s1595_s15, 16, %s1593_s18, %s891_s23  }
 0x404 PF: > { %p1198_p1 = scmp.ge.s32.totalorder %s1325_s14, 2  ;;  %s915_s24 = sand.u32 1, %s1313_s11  }
 0x405   : > { %s916_s25 = scalar_lea.sflag [#allocation4], %s915_s24 }
 0x406   : > { %p1195_p2 = pnand %p1198_p1, %p1424_p6 }
 0x408   : > { %1308 = dma.done.wait (!%p1195_p2), %s916_s25, 16  }
 0x409   : > { %1310 = vsyncadd (!%p1195_p2), %s916_s25, 4294967280  ;;  %p21_p3 = scmp.ge.s32.totalorder %s1408_s16, 4   ;;  %s1649_s11 = smov %s1317_s12 }
 0x40a   : > { %s1650_s12 = smov %s1321_s13  ;;  %s1651_s13 = smov %s1418_s19 }
 0x40b   : > { %s1652_s14 = smov %s1408_s16  ;;  %23 = sbr.rel (!%p21_p3) target bundleno = 6 (0x6), region = 91 }
 0x412   :  { %920 = vsyncpa [#allocation4], 1 }
 0x413   :  { %922 = vsyncpa [#allocation4 + $0x1], 1 }

</bundles_post_ra>
